<compile_context>
chip_gen: v6e
topology: v6e:2x2x1
jax: 0.10.0
libtpu: 0.0.40
codegen_flags: <defaults>
</compile_context>

<pallas_src>
import jax
import jax.numpy as jnp
from jax.experimental import pallas as pl
from jax.experimental.pallas import tpu as pltpu


def mlp_kernel(x_ref, w1_ref, w2_ref, tail_ref, o_ref):
    # fc1 + ReLU : bf16 MXU operands (x already streamed as bf16), f32 accumulation.
    x = x_ref[...]                                   # (TB, 300) bf16
    b1 = tail_ref[0:1, 0:100]                        # (1, 100) f32
    h1 = jnp.dot(x, w1_ref[...], preferred_element_type=jnp.float32) + b1
    h1 = jnp.maximum(h1, 0.0).astype(jnp.bfloat16)

    # fc2 + ReLU
    b2 = tail_ref[1:2, 0:25]                         # (1, 25) f32
    h2 = jnp.dot(h1, w2_ref[...], preferred_element_type=jnp.float32) + b2
    h2 = jnp.maximum(h2, 0.0)                        # (TB, 25) f32

    # fc3 (25 -> 2) + 2-class softmax folded into a logit difference + sigmoid.
    w3d = tail_ref[2:3, 0:25]                        # (1, 25) = w3[:,0] - w3[:,1]
    b3d = tail_ref[3:4, 0:1]                         # (1, 1)  = b3[0]   - b3[1]
    d = jnp.sum(h2 * w3d, axis=-1, keepdims=True) + b3d       # (TB, 1)
    p0 = 1.0 / (1.0 + jnp.exp(-d))                   # exact; saturates cleanly
    o_ref[...] = jnp.concatenate([p0, 1.0 - p0], axis=-1).astype(o_ref.dtype)


def net_forward(x, packed_params, *, block_b=1024):
    """packed_params = (w1_bf16 (300,100), w2_bf16 (100,25), tail_f32 (4,128)).

    x: (B, 300), ideally already bf16 (cast fused into the producer); f32 is
    accepted but costs one extra pass over x.
    """
    w1, w2, tail = packed_params
    B, K = x.shape
    assert K == 300
    if x.dtype != jnp.bfloat16:
        # TODO(synk): have the upstream producer emit bf16 so this cast fuses away.
        x = x.astype(jnp.bfloat16)

    # Batch tile: multiple of 16 sublanes (bf16 packing).  No host-side padding:
    # the grid is cdiv(B, tb) and Pallas masks the ragged last block (rows are
    # independent; masked output write only touches valid rows).
    tb_req = max(16, (block_b // 16) * 16)
    b_ceil = ((B + 15) // 16) * 16
    tb = min(tb_req, b_ceil)
    if B > 16:
        # v7x megacore: keep >= 2 grid steps so the "parallel" batch axis shards
        # across both TensorCores; harmless on single-TC v5e/v6e.
        half = (((b_ceil // 2) + 15) // 16) * 16
        tb = min(tb, max(16, half))
    nb = pl.cdiv(B, tb)

    # Scheduling hint for XLA when this call sits inside a larger jit graph.
    flops = 2 * B * (300 * 100 + 100 * 25 + 25)
    bytes_accessed = (B * 300 * 2 + B * 2 * 4
                      + (300 * 100 + 100 * 25) * 2 + 4 * 128 * 4)
    cost = pl.CostEstimate(flops=flops, transcendentals=B,
                           bytes_accessed=bytes_accessed)

    out = pl.pallas_call(
        mlp_kernel,
        out_shape=jax.ShapeDtypeStruct((B, 2), jnp.float32),
        grid_spec=pltpu.PrefetchScalarGridSpec(
            num_scalar_prefetch=0,
            grid=(nb,),
            in_specs=[
                pl.BlockSpec((tb, 300), lambda i: (i, 0)),     # streamed bf16 x
                pl.BlockSpec((300, 100), lambda i: (0, 0)),    # resident weights
                pl.BlockSpec((100, 25), lambda i: (0, 0)),
                pl.BlockSpec((4, 128), lambda i: (0, 0)),      # packed biases + fc3 diff
            ],
            out_specs=pl.BlockSpec((tb, 2), lambda i: (i, 0)),
        ),
        compiler_params=pltpu.CompilerParams(
            dimension_semantics=("parallel",),
        ),
        cost_estimate=cost,
    )(x, w1, w2, tail)
    return out


def init_params(key):
    # Deterministic init mimicking PyTorch nn.Linear: U(-1/sqrt(fan_in), +1/sqrt(fan_in)).
    # Weights stored already-transposed as (in, out) so forward is x @ W.
    def linear(key, fan_in, fan_out):
        kw, kb = jax.random.split(key)
        bound = 1.0 / jnp.sqrt(fan_in)
        w = jax.random.uniform(kw, (fan_in, fan_out), jnp.float32, -bound, bound)
        b = jax.random.uniform(kb, (1, fan_out), jnp.float32, -bound, bound)
        return w, b

    k1, k2, k3 = jax.random.split(key, 3)
    w1, b1 = linear(k1, 300, 100)
    w2, b2 = linear(k2, 100, 25)
    w3, b3 = linear(k3, 25, 2)
    return w1, b1, w2, b2, w3, b3


def pack_params(params):
    """Cast matmul weights to bf16 and pack small f32 tensors into one (4,128) buffer."""
    w1, b1, w2, b2, w3, b3 = params
    tail = jnp.zeros((4, 128), jnp.float32)
    tail = tail.at[0, :100].set(b1.reshape(-1))
    tail = tail.at[1, :25].set(b2.reshape(-1))
    tail = tail.at[2, :25].set(w3[:, 0] - w3[:, 1])
    tail = tail.at[3, 0].set(b3.reshape(-1)[0] - b3.reshape(-1)[1])
    return w1.astype(jnp.bfloat16), w2.astype(jnp.bfloat16), tail


if __name__ == "__main__":
    key = jax.random.PRNGKey(0)
    kx, kp = jax.random.split(key)
    # B=40 with block_b=16 -> 3 grid steps, the last one a ragged partial block,
    # exercising both the batch pipeline and the no-pad masked-tail path.
    B = 40
    x_f32 = jax.random.normal(kx, (B, 300), jnp.float32)
    x_bf16 = x_f32.astype(jnp.bfloat16)        # stream bf16 into the kernel
    params = init_params(kp)
    packed = pack_params(params)

    out = net_forward(x_bf16, packed, block_b=16)
    out = jax.block_until_ready(out)
    assert out.shape == (B, 2)
    assert bool(jnp.all(jnp.isfinite(out)))

    w1, b1, w2, b2, w3, b3 = params

    # Reference 1: same mixed-precision recipe as the kernel (bf16 x and weights
    # on the MXU, f32 accumulation), f32 head -> tight tolerance.
    h1 = jnp.maximum(
        jnp.dot(x_bf16, w1.astype(jnp.bfloat16),
                preferred_element_type=jnp.float32) + b1, 0.0)
    h2 = jnp.maximum(
        jnp.dot(h1.astype(jnp.bfloat16), w2.astype(jnp.bfloat16),
                preferred_element_type=jnp.float32) + b2, 0.0)
    ref_mixed = jax.nn.softmax(h2 @ w3 + b3, axis=1)
    assert jnp.allclose(out, ref_mixed, atol=1e-4, rtol=1e-4)

    # Reference 2: the original full-f32 module forward; loose tolerance covers
    # the bf16 x / bf16 weight quantization.
    h1f = jnp.maximum(x_f32 @ w1 + b1, 0.0)
    h2f = jnp.maximum(h1f @ w2 + b2, 0.0)
    ref_f32 = jax.nn.softmax(h2f @ w3 + b3, axis=1)
    assert jnp.allclose(out, ref_f32, atol=5e-2)

    print("KERNEL_OK")
</pallas_src>

<mosaic_0001>
module attributes {stable_mosaic.version = 11 : i64} {
  func.func @mlp_kernel(%arg0: i32, %arg1: memref<16x300xbf16, #tpu.memory_space<vmem>>, %arg2: memref<300x100xbf16, #tpu.memory_space<vmem>>, %arg3: memref<100x25xbf16, #tpu.memory_space<vmem>>, %arg4: memref<4x128xf32, #tpu.memory_space<vmem>>, %arg5: memref<16x2xf32, #tpu.memory_space<vmem>>) attributes {dimension_semantics = [#tpu.dimension_semantics<parallel>], iteration_bounds = array<i64: 3>, scalar_prefetch = 0 : i64, scratch_operands = 0 : i64, tpu.core_type = #tpu.core_type<tc>, window_params = [{transform_indices = @transform_0, window_bounds = array<i64: 16, 300>}, {pipeline_mode = #tpu.pipeline_mode<synchronous>, transform_indices = @transform_1, window_bounds = array<i64: 300, 100>}, {pipeline_mode = #tpu.pipeline_mode<synchronous>, transform_indices = @transform_2, window_bounds = array<i64: 100, 25>}, {pipeline_mode = #tpu.pipeline_mode<synchronous>, transform_indices = @transform_3, window_bounds = array<i64: 4, 128>}, {transform_indices = @transform_4, window_bounds = array<i64: 16, 2>}]} {
    %c0 = arith.constant 0 : index
    %c0_0 = arith.constant 0 : index
    %0 = vector.load %arg1[%c0, %c0_0] : memref<16x300xbf16, #tpu.memory_space<vmem>>, vector<16x300xbf16>
    %c0_1 = arith.constant 0 : index
    %c0_2 = arith.constant 0 : index
    %1 = vector.load %arg4[%c0_1, %c0_2] : memref<4x128xf32, #tpu.memory_space<vmem>>, vector<1x100xf32>
    %c0_3 = arith.constant 0 : index
    %c0_4 = arith.constant 0 : index
    %2 = vector.load %arg2[%c0_3, %c0_4] : memref<300x100xbf16, #tpu.memory_space<vmem>>, vector<300x100xbf16>
    %cst = arith.constant dense<0.000000e+00> : vector<16x100xf32>
    %3 = tpu.matmul %0, %2, %cst {dimension_numbers = #tpu.dot_dimension_numbers<[1], [0], [0], [1], [0, 0, 1, 1], [], []>} : vector<16x300xbf16>, vector<300x100xbf16>, vector<16x100xf32> -> vector<16x100xf32>
    %4 = vector.broadcast %1 : vector<1x100xf32> to vector<16x100xf32>
    %5 = arith.addf %3, %4 : vector<16x100xf32>
    %cst_5 = arith.constant 0.000000e+00 : f32
    %6 = vector.broadcast %cst_5 : f32 to vector<16x100xf32>
    %7 = arith.maximumf %5, %6 : vector<16x100xf32>
    %8 = arith.truncf %7 : vector<16x100xf32> to vector<16x100xbf16>
    %c1 = arith.constant 1 : index
    %c0_6 = arith.constant 0 : index
    %9 = vector.load %arg4[%c1, %c0_6] : memref<4x128xf32, #tpu.memory_space<vmem>>, vector<1x25xf32>
    %c0_7 = arith.constant 0 : index
    %c0_8 = arith.constant 0 : index
    %10 = vector.load %arg3[%c0_7, %c0_8] : memref<100x25xbf16, #tpu.memory_space<vmem>>, vector<100x25xbf16>
    %cst_9 = arith.constant dense<0.000000e+00> : vector<16x25xf32>
    %11 = tpu.matmul %8, %10, %cst_9 {dimension_numbers = #tpu.dot_dimension_numbers<[1], [0], [0], [1], [0, 0, 1, 1], [], []>} : vector<16x100xbf16>, vector<100x25xbf16>, vector<16x25xf32> -> vector<16x25xf32>
    %12 = vector.broadcast %9 : vector<1x25xf32> to vector<16x25xf32>
    %13 = arith.addf %11, %12 : vector<16x25xf32>
    %cst_10 = arith.constant 0.000000e+00 : f32
    %14 = vector.broadcast %cst_10 : f32 to vector<16x25xf32>
    %15 = arith.maximumf %13, %14 : vector<16x25xf32>
    %c2 = arith.constant 2 : index
    %c0_11 = arith.constant 0 : index
    %16 = vector.load %arg4[%c2, %c0_11] : memref<4x128xf32, #tpu.memory_space<vmem>>, vector<1x25xf32>
    %c3 = arith.constant 3 : index
    %c0_12 = arith.constant 0 : index
    %17 = vector.load %arg4[%c3, %c0_12] : memref<4x128xf32, #tpu.memory_space<vmem>>, vector<1x1xf32>
    %18 = vector.broadcast %16 : vector<1x25xf32> to vector<16x25xf32>
    %19 = arith.mulf %15, %18 : vector<16x25xf32>
    %cst_13 = arith.constant dense<0.000000e+00> : vector<16xf32>
    %20 = vector.multi_reduction <add>, %19, %cst_13 [1] : vector<16x25xf32> to vector<16xf32>
    %21 = vector.shape_cast %20 : vector<16xf32> to vector<16x1xf32>
    %22 = vector.broadcast %17 : vector<1x1xf32> to vector<16x1xf32>
    %23 = arith.addf %21, %22 : vector<16x1xf32>
    %cst_14 = arith.constant 0.000000e+00 : f32
    %24 = vector.broadcast %cst_14 : f32 to vector<16x1xf32>
    %25 = arith.subf %24, %23 : vector<16x1xf32>
    %26 = math.exp %25 : vector<16x1xf32>
    %cst_15 = arith.constant 1.000000e+00 : f32
    %27 = vector.broadcast %cst_15 : f32 to vector<16x1xf32>
    %28 = arith.addf %27, %26 : vector<16x1xf32>
    %cst_16 = arith.constant 1.000000e+00 : f32
    %29 = vector.broadcast %cst_16 : f32 to vector<16x1xf32>
    %30 = arith.divf %29, %28 : vector<16x1xf32>
    %cst_17 = arith.constant 1.000000e+00 : f32
    %31 = vector.broadcast %cst_17 : f32 to vector<16x1xf32>
    %32 = arith.subf %31, %30 : vector<16x1xf32>
    %33 = tpu.concatenate %30, %32 in 1 : vector<16x1xf32>, vector<16x1xf32> -> vector<16x2xf32>
    %c0_18 = arith.constant 0 : index
    %c0_19 = arith.constant 0 : index
    %34 = vector.load %arg5[%c0_18, %c0_19] : memref<16x2xf32, #tpu.memory_space<vmem>>, vector<16x2xf32>
    tpu.vector_store %arg5[%c0_18, %c0_19], %33 {strides = array<i32>} : memref<16x2xf32, #tpu.memory_space<vmem>>, vector<16x2xf32>,
    return
  }
  func.func @transform_0(%arg0: i32) -> (i32, i32) {
    %c0_i32 = arith.constant 0 : i32
    %c0_i32_0 = arith.constant 0 : i32
    return %arg0, %c0_i32 : i32, i32
  }
  func.func @transform_1(%arg0: i32) -> (i32, i32) {
    %c0_i32 = arith.constant 0 : i32
    %c0_i32_0 = arith.constant 0 : i32
    %c0_i32_1 = arith.constant 0 : i32
    return %c0_i32, %c0_i32_0 : i32, i32
  }
  func.func @transform_2(%arg0: i32) -> (i32, i32) {
    %c0_i32 = arith.constant 0 : i32
    %c0_i32_0 = arith.constant 0 : i32
    %c0_i32_1 = arith.constant 0 : i32
    return %c0_i32, %c0_i32_0 : i32, i32
  }
  func.func @transform_3(%arg0: i32) -> (i32, i32) {
    %c0_i32 = arith.constant 0 : i32
    %c0_i32_0 = arith.constant 0 : i32
    %c0_i32_1 = arith.constant 0 : i32
    return %c0_i32, %c0_i32_0 : i32, i32
  }
  func.func @transform_4(%arg0: i32) -> (i32, i32) {
    %c0_i32 = arith.constant 0 : i32
    %c0_i32_0 = arith.constant 0 : i32
    return %arg0, %c0_i32 : i32, i32
  }
}

</mosaic_0001>

<bundles_post_ra>
// kernel: tpu_custom_call.1
= control target key start
LH: loop header
LB: loop body
LE: loop exit
PB: predicated region body
PF: predicated region fallthrough
CT: control target
= control target key end

     0   :  { %9 = vsyncpa [#allocation3], 0  ;;  %s1318_s15 = smov 0   ;;  %s1320_s16 = smov 0   ;;  %s1466_s0 = inlined_call_operand.vmem [shape: bf16[40,300], index: 0, kind: input, shape index: {}]   ;;  %s1467_s1 = inlined_call_operand.hbm [shape: bf16[300,100], index: 1, kind: input, shape index: {}]   ;;  %s1468_s2 = inlined_call_operand.vmem [shape: bf16[100,25], index: 2, kind: input, shape index: {}]   ;;  %s1469_s3 = inlined_call_operand.vmem [shape: f32[4,128], index: 3, kind: input, shape index: {}]   ;;  %s1470_s4 = inlined_call_operand.vmem [shape: f32[40,2], index: 4, kind: output, shape index: {}]  }
   0x1   :  { %s1322_s17 = smov 0  }
   0x2 LB: > { %s1331_s18 = sadd.s32 4294967295, %s1253_s17   ;;  %s1333_s19 = sadd.s32 1, %s1253_s17   ;;  %s1253_s17 = sphi %s1322_s17, %s1475_s17   ;;  %s1249_s16 = sphi %s1320_s16, %s1474_s16   ;;  %s1245_s15 = sphi %s1318_s15, %s1473_s15  }
   0x3   : > { %s108_s20 = ssub.s32 %s1253_s17, %s1333_s19  ;;  %s111_s21 = sadd.s32 1, %s1249_s16 }
   0x4   : > { %p109_p0 = scmp.eq.s32.totalorder %s108_s20, 0  ;;  %p121_p1 = scmp.ne.s32.totalorder %s1249_s16, %s1245_s15 }
   0x5   : > { %p122_p2 = scmp.eq.s32.totalorder %s1331_s18, 2  ;;  %p901_p3 = scmp.ge.s32.totalorder %s1253_s17, 1 }
   0x6   : > { %s1341_s22 = scalar_select %p109_p0, %s1249_s16, %s111_s21  }
   0x7   : > { %p1343_p4 = por %p122_p2, %p121_p1  ;;  %p135_p5 = scmp.lt.s32.totalorder %s1253_s17, 4 }
   0x8   : > { %p1035_p6 = scmp.eq.s32.totalorder %s1331_s18, 0  ;;  %s1287_s25 = smov [#allocation2]  }
   0x9   : > { %p1348_p7 = pnand %p901_p3, %p135_p5  ;;  %s147_s26 = sshll.u32 %s1287_s25, 4  ;;  %s148_s26 = int_to_ptr.vmem [resolvable:$true] %s147_s26 }
   0xa   : > { %s1180_s27 = scalar_lea.vmem %s148_s26, 2432  ;;  %p1188_p0 = scmp.lt.s32.totalorder %s148_s26, %s148_s26 }
   0xb   : > { %p1031_p8 = pneg %p1348_p7  ;;  %p1181_p11 = scmp.ne.s32.totalorder %s148_s26, %s1180_s27 }
   0xc   : > { %p1189_p1 = scmp.lt.s32.totalorder %s1180_s27, %s1180_s27 }
   0xd   : > { %p1032_p9 = pnand %p1035_p6, %p1031_p8 }
   0xe   : > { %p1190_p2 = por %p1189_p1, %p1188_p0 }
   0xf   : > { %p1171_p10 = pneg %p1032_p9 }
  0x11   : > { %p1183_p12 = pnand %p1181_p11, %p1171_p10 }
  0x13   : > { %p1184_p13 = pneg %p1183_p12 }
  0x15   : > { %p1191_p3 = pnand %p1190_p2, %p1184_p13 }
  0x17   : > { %1194 = shalt.err (!%p1191_p3)
}
  0x18   : > { %s1288_s28 = smov 64   ;;  %s1289_s29 = smov 4  }
  0x19   : > { %1034 = dma.hbm_to_vmem [thread:$0]  (!%p1032_p9), %s1467_s1, 2432, %s148_s26, [#allocation3], %s1288_s28, %s1288_s28, %s1289_s29  }
  0x1a   : > { %189 = sbr.rel (%p1348_p7) target bundleno = 811 (0x32b), region = 36 }
  0x1f   : > { %1240 = dma.done.wait (%p1035_p6), [#allocation3], 2432  }
  0x20   : > { %1242 = vsyncadd (%p1035_p6), [#allocation3], 4294964864  ;;  %v1290_v0 = vmov 0.0   ;;  %vm1291_vm0 = vmmov 0   ;;  %v1131_v1 = vld [vmem:[#allocation2 + $0x78] sm:$0xff]   ;;  %v1133_v3 = vld [vmem:[#allocation2 + $0x70] sm:$0xff]  }
  0x21   : > { %998 = vmatprep.subr.bf16.mxu1 %v1290_v0  ;;  %1004 = vmatprep.mubr.msk.bf16.mxu1 %vm1291_vm0, %v1290_v0  ;;  %v1132_v2 = vld [vmem:[#allocation2 + $0x38] sm:$0xff]   ;;  %s1369_s6 = sshll.u32 %s1331_s18, 1  ;;  %v1134_v4 = vld [vmem:[#allocation2 + $0x30] sm:$0xff]   ;;  %v1135_v5 = vld [vmem:[#allocation2 + $0x68] sm:$0xff]   ;;  %vm422_vm1 = vcmask 1045504   ;;  %vm572_vm2 = vcmask 1041408  }
  0x22   : > { %964 = vmatprep.subr.bf16.mxu0 %v1131_v1  ;;  %p226_p5 = scmp.lt.s32.totalorder %s1369_s6, 4  ;;  %v1136_v6 = vld [vmem:[#allocation2 + $0x28] sm:$0xff]   ;;  %v1137_v7 = vld [vmem:[#allocation2 + $0x60] sm:$0xff]   ;;  %v1139_v9 = vld [vmem:[#allocation2 + $0x58] sm:$0xff]   ;;  %vm418_vm3 = vcmask 359424   ;;  %vm568_vm4 = vcmask 818176  }
  0x23   : > { %965 = vmatpush3.bf16.msra.mxu0 %v1132_v2  ;;  %v1138_v8 = vld [vmem:[#allocation2 + $0x20] sm:$0xff]   ;;  %v1143_v10 = vld [vmem:[#allocation2 + $0x90] sm:$0x3f]   ;;  %v1140_v11 = vld [vmem:[#allocation2 + $0x18] sm:$0xff]   ;;  %vm627_vm5 = vcmask 203776   ;;  %s1292_s17 = smov 1  }
  0x24   : > { %966 = vmatprep.subr.bf16.mxu0 %v1133_v3  ;;  %s227_s7 = scalar_select %p226_p5, %s1369_s6, 4  ;;  %v424_v12 = vsel %vm422_vm1, %v1143_v10, 0  ;;  %v1146_v13 = vld [vmem:[#allocation2 + $0x88] sm:$0xff]   ;;  %v1141_v14 = vld [vmem:[#allocation2 + $0x50] sm:$0xff]   ;;  %v1149_v17 = vld [vmem:[#allocation2 + $0x80] sm:$0xff]   ;;  %vm662_vm6 = vcmask 7168  }
  0x25   : > { %999 = vmatpush3.bf16.msra.mxu1 %v424_v12  ;;  %v1142_v15 = vld [vmem:[#allocation2 + $0x10] sm:$0xff]   ;;  %v1144_v16 = vld [vmem:[#allocation2 + $0x48] sm:$0xff]   ;;  %v1147_v22 = vld [vmem:[#allocation2 + $0x40] sm:$0xff]   ;;  %s217_s20 = sand.u32 1, %s1245_s15   ;;  %vm665_vm7 = vcmask 15360   ;;  %s676_s25 = ssub.s32 (%p1343_p4), 5, %s1369_s6 }
  0x26   : > { %s1026_s8 = smul.u32 12, %s227_s7  ;;  %1000 = vmatprep.subr.bf16.mxu1 %v1290_v0  ;;  %v1154_v20 = vld [vmem:[%s1468_s2 + $0x30] ss:$0 sps:$4 sm:$0x33]   ;;  %v1145_v21 = vld [vmem:[#allocation2 + $0x8] sm:$0xff]   ;;  %v1148_v24 = vld [vmem:[#allocation2] sm:$0xff]  }
  0x27   : > { %967 = vmatpush3.bf16.msra.mxu0 %v1134_v4  ;;  %v574_v23 = vsel %vm572_vm2, %v1154_v20, 0  ;;  %v1155_v25 = vld [vmem:[%s1468_s2 + $0x28] sm:$0xff]   ;;  %v1156_v27 = vld [vmem:[%s1468_s2 + $0x20] sm:$0xff]   ;;  %v1157_v28 = vld [vmem:[%s1468_s2 + $0x18] sm:$0xff]   ;;  %s906_s21 = sshll.u32 %s217_s20, 4  ;;  %s961_s15 = sshll.u32 (%p1343_p4), %s1331_s18, 4 }
  0x28   : > { %968 = vmatprep.subr.bf16.mxu0 %v1135_v5  ;;  %s230_s11 = scalar_lea.vmem %s1466_s0, %s1026_s8  ;;  %v1158_v29 = vld [vmem:[%s1468_s2 + $0x10] sm:$0xff]   ;;  %v1159_v30 = vld [vmem:[%s1468_s2 + $0x8] sm:$0xff]   ;;  %v1160_v31 = vld [vmem:[%s1468_s2] sm:$0xff]   ;;  %s1421_s24 = scalar_lea.vmem [#allocation4], %s906_s21  }
  0x29   : > { %1001 = vmatpush3.bf16.msra.mxu1 %v1146_v13  ;;  %v1152_v18 = vld [vmem:[%s230_s11 + $0x4] ss:$12 sps:$4 sm:$0xff]   ;;  %v1153_v19 = vld [vmem:[%s230_s11 + $0x8] ss:$12 sps:$4 sm:$0xff]   ;;  %v1150_v26 = vld [vmem:[%s230_s11] ss:$12 sps:$4 sm:$0xff]   ;;  %s1432_s28 = scalar_lea.vmem (%p1343_p4), %s1470_s4, %s961_s15  }
  0x2a   : > { %1002 = vmatprep.subr.bf16.mxu1 %v1290_v0  ;;  %458 = vmatprep.mubr.bf16.mxu0 %v1152_v18  ;;  %v909_v37 = vld [vmem:[%s1469_s3] ss:$0 sm:$0xff]  ;;  %v933_v50 = vld [vmem:[%s1469_s3 + $0x1] ss:$0 sm:$0xff]  ;;  %v942_v54 = vld [vmem:[%s1469_s3 + $0x2] ss:$0 sm:$0xff] }
  0x2b   : > { %969 = vmatpush3.bf16.msra.mxu0 %v1136_v6  ;;  %p677_p6 = scmp.lt.s32.totalorder (%p1343_p4), %s676_s25, 2 }
  0x2c   : > { %970 = vmatprep.subr.bf16.mxu0 %v1137_v7 }
  0x2d   : > { %1003 = vmatpush3.bf16.msra.mxu1 %v1149_v17 }
  0x2e   : > { %1008 = vmatprep.subr.bf16.mxu1 %v1290_v0 }
  0x2f   : > { %971 = vmatpush3.bf16.msra.mxu0 %v1138_v8 }
  0x30   : > { %972 = vmatprep.subr.bf16.mxu0 %v1139_v9  ;;  %1005 = vmatmul.mubr.msk.bf16.vlgmr.msra.gmra.mxu1 %vm418_vm3, %v1153_v19 }
  0x31   : > { %1009 = vmatpush3.bf16.msra.mxu1 %v574_v23  ;;  %1022 = vmatprep.mubr.msk.bf16.mxu1 %vm1291_vm0, %v1290_v0 }
  0x32   : > { %1010 = vmatprep.subr.bf16.mxu1 %v1290_v0 }
  0x33   : > { %973 = vmatpush3.bf16.msra.mxu0 %v1140_v11 }
  0x34   : > { %974 = vmatprep.subr.bf16.mxu0 %v1141_v14 }
  0x35   : > { %1011 = vmatpush3.bf16.msra.mxu1 %v1155_v25 }
  0x36   : > { %1012 = vmatprep.subr.bf16.mxu1 %v1290_v0 }
  0x37   : > { %975 = vmatpush3.bf16.msra.mxu0 %v1142_v15 }
  0x38   : > { %976 = vmatprep.subr.bf16.mxu0 %v1144_v16 }
  0x39   : > { %1013 = vmatpush3.bf16.msra.mxu1 %v1156_v27 }
  0x3a   : > { %1014 = vmatprep.subr.bf16.mxu1 %v1290_v0 }
  0x3b   : > { %977 = vmatpush3.bf16.msra.mxu0 %v1145_v21 }
  0x3c   : > { %978 = vmatprep.subr.bf16.mxu0 %v1147_v22 }
  0x3d   : > { %1015 = vmatpush3.bf16.msra.mxu1 %v1157_v28 }
  0x3e   : > { %1016 = vmatprep.subr.bf16.mxu1 %v1290_v0 }
  0x3f   : > { %979 = vmatpush3.bf16.msra.mxu0 %v1148_v24 }
  0x41   : > { %1017 = vmatpush3.bf16.msra.mxu1 %v1158_v29 }
  0x42   : > { %459 = vmatmul.mubr.bf16.vlgmr.msra.gmra.mxu0 %v1150_v26  ;;  %1018 = vmatprep.subr.bf16.mxu1 %v1290_v0 }
  0x45   : > { %1019 = vmatpush3.bf16.msra.mxu1 %v1159_v30 }
  0x46   : > { %1020 = vmatprep.subr.bf16.mxu1 %v1290_v0  ;;  %v943_v0 = vld [vmem:[%s1469_s3 + $0x3] ss:$0 sm:$0xff] }
  0x49   : > { %1021 = vmatpush3.bf16.msra.mxu1 %v1160_v31 }
  0xf0   : > { %v501_v32 = vpop.f32.mrf.mxu1 }
  0xf2   : > { %v1006_v33 = vpop.f32.mrf.mxu1 }
  0xf4   : > { %v504_v34 = vpop.f32.mrf.mxu1 }
  0xf6   : > { %v1007_v35 = vpop.f32.mrf.mxu1 }
 0x102   : > { %v980_v36 = vpop.f32.mrf.mxu0 }
 0x104   : > { %v981_v38 = vpop.f32.mrf.mxu0 }
 0x105   : > { %v982_v39 = vadd.f32 %v981_v38, %v980_v36 }
 0x106   : > { %v983_v40 = vpop.f32.mrf.mxu0 }
 0x107   : > { %v461_v41 = vadd.f32 %v982_v39, %v909_v37 }
 0x108   : > { %v984_v42 = vpop.f32.mrf.mxu0 }
 0x109   : > { %v985_v43 = vadd.f32 %v984_v42, %v983_v40  ;;  %v502_v44 = vadd.f32 %v501_v32, %v461_v41 }
 0x10b   : > { %v464_v45 = vadd.f32 %v985_v43, %v909_v37  ;;  %v508_v47 = vmax.f32 %v502_v44, 0.0 }
 0x10d   : > { %v505_v46 = vadd.f32 %v504_v34, %v464_v45 }
 0x10f   : > { %v509_v48 = vmax.f32 %v505_v46, 0.0 }
 0x111   : > { %v510_v49 = vpack.c.bf16 %v509_v48, %v508_v47 }
 0x113   : > { %1023 = vmatmul.mubr.msk.bf16.vlgmr.msra.gmra.mxu1 %vm568_vm4, %v510_v49 }
 0x1d3   : > { %v610_v51 = vpop.f32.mrf.mxu1 }
 0x1d4   : > { %v611_v52 = vadd.f32 %v933_v50, %v610_v51 }
 0x1d5   : > { %v1024_v53 = vpop.f32.mrf.mxu1 }
 0x1d6   : > { %v617_v55 = vmax.f32 %v611_v52, 0.0 }
 0x1d7   : > { %v613_v56 = vpop.f32.mrf.mxu1 }
 0x1d8   : > { %v614_v57 = vadd.f32 %v933_v50, %v613_v56  ;;  %v625_v58 = vmul.f32 %v942_v54, %v617_v55 }
 0x1d9   : > { %v1025_v59 = vpop.f32.mrf.mxu1 }
 0x1da   : > { %v618_v60 = vmax.f32 %v614_v57, 0.0  ;;  %v628_v61 = vsel %vm627_vm5, %v625_v58, 0.0 }
 0x1db   : > { %629 = vadd.xlane.f32.xlu0 %v628_v61 }
 0x1dc   : > { %v626_v62 = vmul.f32 %v942_v54, %v618_v60 }
 0x1de   : > { %v631_v63 = vsel %vm627_vm5, %v626_v62, 0.0 }
 0x1df   : > { %632 = vadd.xlane.f32.xlu0 %v631_v63 }
 0x264   : > { %v630_v1 = vpop.xlane.xlu0 %629 }
 0x265   : > { %v638_v2 = vadd.f32 %v943_v0, %v630_v1 }
 0x267   : > { %v640_v3 = vsub.f32 0.0, %v638_v2 }
 0x268   : > { %v633_v4 = vpop.xlane.xlu0 %632 }
 0x269   : > { %v642_v5 = vmul.f32 1.442695, %v640_v3  ;;  %v639_v6 = vadd.f32 %v943_v0, %v633_v4 }
 0x26b   : > { %1161 = vpow2.f32 %v642_v5  ;;  %v641_v7 = vsub.f32 0.0, %v639_v6 }
 0x26d   : > { %v644_v8 = vmul.f32 1.442695, %v641_v7 }
 0x26f   : > { %1163 = vpow2.f32 %v644_v8 }
 0x278   : > { %v1162_v9 = vpop.eup %1161 }
 0x279   : > { %v646_v10 = vadd.f32 1.0, %v1162_v9 }
 0x27b   : > { %1165 = vrcp.f32 %v646_v10 }
 0x27c   : > { %v1164_v11 = vpop.eup %1163 }
 0x27d   : > { %v647_v12 = vadd.f32 1.0, %v1164_v11 }
 0x27f   : > { %1167 = vrcp.f32 %v647_v12 }
 0x288   : > { %v1166_v13 = vpop.eup %1165 }
 0x289   : > { %v652_v14 = vsub.f32 1.0, %v1166_v13 }
 0x28b   : > { %656 = vrot.lane.b32.xlu1 %v652_v14, %s1292_s17 }
 0x28c   : > { %v1168_v15 = vpop.eup %1167 }
 0x28d   : > { %v653_v16 = vsub.f32 1.0, %v1168_v15 }
 0x28f   : > { %658 = vrot.lane.b32.xlu1 %v653_v16, %s1292_s17 }
 0x2fd   : > { %v657_v17 = vpop.permute.xlu1 %656 }
 0x2fe   : > { %v663_v18 = vsel %vm662_vm6, %v1166_v13, %v657_v17 }
 0x2ff   : > { %666 = vst.msk [vmem:[%s1421_s24] sm:$0xff] %vm665_vm7, %v663_v18  ;;  %674 = sbr.rel (!%p1343_p4) target bundleno = 811 (0x32b), region = 44 }
 0x301   : > { %v659_v19 = vpop.permute.xlu1 %658 }
 0x302   : > { %v664_v20 = vsel %vm662_vm6, %v1168_v15, %v659_v19 }
 0x303   : > { %667 = vst.msk [vmem:[%s1421_s24 + $0x8] sm:$0xff] %vm665_vm7, %v664_v20 }
 0x304   : > { %s1477_s25 = smov (!%p677_p6, %s676_s25), 2 }
 0x305   : > { %s946_s29 = sshll.u32 %s1477_s25, 7 }
 0x306   : > { %p949_p7 = scmp.eq.s32.totalorder %s946_s29, 0 }
 0x307   : > { %s1438_s30 = sshrl.u32 (!%p949_p7), %s1477_s25, 1 }
 0x308   : > { %685 = sbr.rel (%p949_p7) target bundleno = 811 (0x32b), region = 48  ;;  %p950_p4 = scmp.le.s32.totalorder (!%p949_p7), %s1438_s30, 0 }
 0x30d   : > { %847 = sbr.rel (%p950_p4) target bundleno = 794 (0x31a), region = 125  ;;  %s1255_s18 = smov (!%p950_p4), %s1432_s28  }
 0x30e   : > { %s1259_s23 = smov (!%p950_p4), %s1421_s24   ;;  %s1263_s6 = smov (!%p950_p4), 0  }
 0x30f   : > { %s1267_s5 = smov (!%p950_p4), 0  }
 0x312 LB: >> { %v750_v21 = vld [vmem:[%s1261_s23] sm:$0xff]  ;;  %v752_v22 = vld [vmem:[%s1261_s23 + $0x8] sm:$0xff]  ;;  %s754_s7 = sadd.s32 1, %s1265_s6  ;;  %s744_s5 = sadd.s32 1, %s1269_s5   ;;  %s1269_s5 = sphi %s1267_s5, %s744_s5   ;;  %s1265_s6 = sphi %s1263_s6, %s1264_s6   ;;  %s1261_s23 = sphi %s1259_s23, %s759_s23   ;;  %s1257_s18 = sphi %s1255_s18, %s760_s18  }
 0x313   : >> { %751 = vst [vmem:[%s1257_s18] sm:$0xff] %v750_v21  ;;  %753 = vst [vmem:[%s1257_s18 + $0x8] sm:$0xff] %v752_v22  ;;  %p755_p8 = scmp.ge.s32.totalorder %s754_s7, %s1438_s30  ;;  %p743_p9 = scmp.ge.s32.totalorder %s744_s5, %s1438_s30 }
 0x315   : >> { %s1479_s7 = smov (%p755_p8, %s754_s7), 0  ;;  %746 = sbr.rel (!%p743_p9) target bundleno = 786 (0x312), region = 131 }
 0x316   : >> { %s951_s8 = sshll.u32 %s1479_s7, 4  ;;  %s1264_s6 = smov %s1479_s7  }
 0x317   : >> { %s759_s23 = scalar_lea.vmem %s1421_s24, %s951_s8 [#allocation4]   ;;  %s760_s18 = scalar_lea.vmem %s1432_s28, %s951_s8  }
 0x31a PF: > { %s1448_s9 = sand.u32 1, %s1477_s25   ;;  %s962_s10 = sshll.u32 %s1438_s30, 4 }
 0x31b   : > { %s765_s11 = scalar_lea.vmem %s1421_s24, %s962_s10 [#allocation4]   ;;  %s767_s12 = scalar_lea.vmem %s1432_s28, %s962_s10  }
 0x31c   : > { %p956_p10 = scmp.le.s32.totalorder %s1448_s9, 0 }
 0x31d   : > { %s1271_s13 = smov (!%p956_p10), %s767_s12   ;;  %s1275_s14 = smov (!%p956_p10), %s765_s11  }
 0x31e   : > { %861 = sbr.rel (%p956_p10) target bundleno = 811 (0x32b), region = 136  ;;  %s1279_s17 = smov (!%p956_p10), 0  }
 0x31f   : > { %s1283_s20 = smov (!%p956_p10), 0  }
 0x323 LB: >> { %v777_v23 = vld [vmem:[%s1277_s14] sm:$0xff]  ;;  %s779_s21 = sadd.s32 1, %s1281_s17  ;;  %s771_s20 = sadd.s32 1, %s1285_s20   ;;  %s1285_s20 = sphi %s1283_s20, %s771_s20   ;;  %s1281_s17 = sphi %s1279_s17, %s1280_s17   ;;  %s1277_s14 = sphi %s1275_s14, %s784_s14   ;;  %s1273_s13 = sphi %s1271_s13, %s785_s13  }
 0x324   : >> { %778 = vst [vmem:[%s1273_s13] sm:$0xff] %v777_v23  ;;  %p780_p11 = scmp.ge.s32.totalorder %s779_s21, %s1448_s9  ;;  %p770_p12 = scmp.ge.s32.totalorder %s771_s20, %s1448_s9 }
 0x326   : >> { %s1481_s21 = smov (%p780_p11, %s779_s21), 0  ;;  %773 = sbr.rel (!%p770_p12) target bundleno = 803 (0x323), region = 142 }
 0x327   : >> { %s957_s24 = sshll.u32 %s1481_s21, 3  ;;  %s1280_s17 = smov %s1481_s21  }
 0x328   : >> { %s784_s14 = scalar_lea.vmem %s765_s11, %s957_s24 [#allocation4]   ;;  %s785_s13 = scalar_lea.vmem %s767_s12, %s957_s24  }
 0x32b PF: > { %p12_p13 = scmp.ge.s32.totalorder %s1333_s19, 5   ;;  %s1473_s15 = smov %s1249_s16 }
 0x32c   : > { %s1474_s16 = smov %s1341_s22  ;;  %s1475_s17 = smov %s1333_s19 }
 0x32d   :  { %14 = sbr.rel (!%p12_p13) target bundleno = 2 (0x2), region = 153 }
 0x332   :  { %801 = vsyncpa [#allocation3], 1 }
 0x333   :  { %803 = vsyncpa [#allocation3 + $0x1], 1 }

</bundles_post_ra>
